<compile_context>
chip_gen: v5e
topology: v5e:2x2
jax: 0.10.0
libtpu: 0.0.40
codegen_flags: <defaults>
</compile_context>

<pallas_src>
import jax
import jax.numpy as jnp
import numpy as np
from jax.experimental import pallas as pl
from jax.experimental.pallas import tpu as pltpu


def _adaptive_pool_matrix(in_size: int, out_size: int) -> np.ndarray:
    """Row i averages input elements in [floor(i*in/out), ceil((i+1)*in/out))."""
    m = np.zeros((out_size, in_size), dtype=np.float32)
    for i in range(out_size):
        start = (i * in_size) // out_size
        end = -(-((i + 1) * in_size) // out_size)  # ceil division
        m[i, start:end] = 1.0 / (end - start)
    return m


def _round_up(x: int, m: int) -> int:
    return ((x + m - 1) // m) * m


def _pick_tile_nc(nc: int, max_tile: int, min_tile: int = 1024) -> int:
    """Largest tile that amortizes per-step overhead but keeps >=2 grid steps
    (v7x has 2 TensorCores sharding the 'parallel' axis) when NC is large."""
    nc128 = _round_up(nc, 128)
    if nc128 <= min_tile:
        return nc128  # single small tile; launch overhead dominates anyway
    return min(max_tile, _round_up(pl.cdiv(nc128, 2), 128))


def _pool_kernel(w_ref, x_ref, o_ref):
    # w_ref: (H*W, Ho*Wo)    -- constant block across the grid (VMEM-resident), f32
    # x_ref: (TILE_NC, H*W)  -- natural layout tile of x
    # o_ref: (TILE_NC, Ho*Wo)
    x = x_ref[...].astype(jnp.float32)
    o_ref[...] = jnp.dot(
        x, w_ref[...], preferred_element_type=jnp.float32
    ).astype(o_ref.dtype)


def adaptive_avg_pool2d(
    x: jax.Array,
    output_size=(5, 5),
    *,
    tile_nc: int = 8192,
    force_pallas: bool = False,
) -> jax.Array:
    """x: (N, C, H, W) float array -> (N, C, Ho, Wo)."""
    n, c, h, w = x.shape
    ho, wo = output_size
    nc = n * c

    # Fused Kronecker pooling weight (kept in float32 for exact 1/k coefficients):
    #   out_flat = x_flat @ WkT,   WkT[hi*W+wi, oi*Wo+oj] = A[oi, hi] * B[oj, wi]
    a = _adaptive_pool_matrix(h, ho)  # (Ho, H)
    b = _adaptive_pool_matrix(w, wo)  # (Wo, W)
    wk_t = jnp.asarray(np.kron(a, b).T)  # (H*W, Ho*Wo), float32

    # Small-input fast path: pallas launch/pipeline overhead dominates for tiny
    # tensors and padding NC up to 128 lanes wastes nearly all the work.
    itemsize = jnp.dtype(x.dtype).itemsize
    if not force_pallas and nc * h * w * itemsize < (256 << 10):
        out = jnp.dot(
            x.reshape(nc, h * w).astype(jnp.float32),
            wk_t,
            preferred_element_type=jnp.float32,
        ).astype(x.dtype)
        return out.reshape(n, c, ho, wo)

    # Natural-layout flatten (free, contiguous); grid tiles the NC axis.
    x_flat = x.reshape(nc, h * w)  # (NC, H*W)

    tile = _pick_tile_nc(nc, tile_nc)
    nc_pad = _round_up(nc, tile)
    if nc_pad != nc:
        x_flat = jnp.pad(x_flat, ((0, nc_pad - nc), (0, 0)))

    grid = (nc_pad // tile,)

    cost = pl.CostEstimate(
        flops=2 * nc_pad * (ho * wo) * (h * w),
        transcendentals=0,
        bytes_accessed=(
            nc_pad * h * w * itemsize          # read x
            + nc_pad * ho * wo * itemsize      # write out
            + (h * w) * (ho * wo) * 4          # read f32 weight once
        ),
    )

    out_flat = pl.pallas_call(
        _pool_kernel,
        out_shape=jax.ShapeDtypeStruct((nc_pad, ho * wo), x.dtype),
        grid=grid,
        in_specs=[
            # Tiny fused weight: same block every step -> stays resident in VMEM.
            pl.BlockSpec((h * w, ho * wo), lambda i: (0, 0)),
            # Pipelined natural-layout input tiles over the NC axis.
            pl.BlockSpec((tile, h * w), lambda i: (i, 0)),
        ],
        out_specs=pl.BlockSpec((tile, ho * wo), lambda i: (i, 0)),
        compiler_params=pltpu.CompilerParams(
            dimension_semantics=("parallel",),
        ),
        cost_estimate=cost,
    )(wk_t, x_flat)

    # Direct reshape -- no transpose, no extra HBM pass.
    return out_flat[:nc].reshape(n, c, ho, wo)


if __name__ == "__main__":
    key = jax.random.PRNGKey(0)

    # Shape consistent with the module's example input: [1, 3, 10, 10].
    # Force the Pallas path so the kernel itself is exercised on this shape.
    x = jax.random.normal(key, (1, 3, 10, 10), dtype=jnp.float32)
    out = jax.block_until_ready(adaptive_avg_pool2d(x, (5, 5), force_pallas=True))
    # Reference: 10 -> 5 is an exact 2x2 average pool.
    ref = x.reshape(1, 3, 5, 2, 5, 2).mean(axis=(3, 5))
    assert out.shape == (1, 3, 5, 5), out.shape
    np.testing.assert_allclose(np.asarray(out), np.asarray(ref), rtol=1e-5, atol=1e-5)

    # Same small input via the default (small-tensor fast) path.
    out_fast = jax.block_until_ready(adaptive_avg_pool2d(x, (5, 5)))
    np.testing.assert_allclose(np.asarray(out_fast), np.asarray(ref), rtol=1e-5, atol=1e-5)

    # Larger N*C exercising the pipelined/padded grid path (N*C = 1024).
    key2 = jax.random.PRNGKey(1)
    x2 = jax.random.normal(key2, (4, 256, 10, 10), dtype=jnp.float32)
    out2 = jax.block_until_ready(adaptive_avg_pool2d(x2, (5, 5)))
    ref2 = x2.reshape(4, 256, 5, 2, 5, 2).mean(axis=(3, 5))
    assert out2.shape == (4, 256, 5, 5), out2.shape
    np.testing.assert_allclose(np.asarray(out2), np.asarray(ref2), rtol=1e-5, atol=1e-5)

    print("KERNEL_OK")
</pallas_src>

<mosaic_0001>
module attributes {stable_mosaic.version = 11 : i64} {
  func.func @_pool_kernel(%arg0: i32, %arg1: memref<100x25xf32, #tpu.memory_space<vmem>>, %arg2: memref<128x100xf32, #tpu.memory_space<vmem>>, %arg3: memref<128x25xf32, #tpu.memory_space<vmem>>) attributes {dimension_semantics = [#tpu.dimension_semantics<parallel>], iteration_bounds = array<i64: 1>, scalar_prefetch = 0 : i64, scratch_operands = 0 : i64, tpu.core_type = #tpu.core_type<tc>, window_params = [{pipeline_mode = #tpu.pipeline_mode<synchronous>, transform_indices = @transform_0, window_bounds = array<i64: 100, 25>}, {transform_indices = @transform_1, window_bounds = array<i64: 128, 100>}, {transform_indices = @transform_2, window_bounds = array<i64: 128, 25>}]} {
    %c0 = arith.constant 0 : index
    %c0_0 = arith.constant 0 : index
    %0 = vector.load %arg2[%c0, %c0_0] : memref<128x100xf32, #tpu.memory_space<vmem>>, vector<128x100xf32>
    %c0_1 = arith.constant 0 : index
    %c0_2 = arith.constant 0 : index
    %1 = vector.load %arg1[%c0_1, %c0_2] : memref<100x25xf32, #tpu.memory_space<vmem>>, vector<100x25xf32>
    %cst = arith.constant dense<0.000000e+00> : vector<128x25xf32>
    %2 = tpu.matmul %0, %1, %cst {dimension_numbers = #tpu.dot_dimension_numbers<[1], [0], [0], [1], [0, 0, 1, 1], [], []>} : vector<128x100xf32>, vector<100x25xf32>, vector<128x25xf32> -> vector<128x25xf32>
    %c0_3 = arith.constant 0 : index
    %c0_4 = arith.constant 0 : index
    %3 = vector.load %arg3[%c0_3, %c0_4] : memref<128x25xf32, #tpu.memory_space<vmem>>, vector<128x25xf32>
    tpu.vector_store %arg3[%c0_3, %c0_4], %2 {strides = array<i32>} : memref<128x25xf32, #tpu.memory_space<vmem>>, vector<128x25xf32>,
    return
  }
  func.func @transform_0(%arg0: i32) -> (i32, i32) {
    %c0_i32 = arith.constant 0 : i32
    %c0_i32_0 = arith.constant 0 : i32
    %c0_i32_1 = arith.constant 0 : i32
    return %c0_i32, %c0_i32_0 : i32, i32
  }
  func.func @transform_1(%arg0: i32) -> (i32, i32) {
    %c0_i32 = arith.constant 0 : i32
    %c0_i32_0 = arith.constant 0 : i32
    return %arg0, %c0_i32 : i32, i32
  }
  func.func @transform_2(%arg0: i32) -> (i32, i32) {
    %c0_i32 = arith.constant 0 : i32
    %c0_i32_0 = arith.constant 0 : i32
    return %arg0, %c0_i32 : i32, i32
  }
}

</mosaic_0001>

<bundles_post_ra>
// kernel: tpu_custom_call.1
= control target key start
LH: loop header
LB: loop body
LE: loop exit
PB: predicated region body
PF: predicated region fallthrough
CT: control target
= control target key end

     0   :  { %vm89_vm0 = vcmask 1043456   ;;  %vm40_vm1 = vcmask 818176   ;;  %vm158_vm2 = vcmask 203776   ;;  %s417_s0 = inlined_call_operand.vmem [shape: f32[100,25], index: 0, kind: input, shape index: {}]   ;;  %s418_s1 = inlined_call_operand.vmem [shape: f32[128,100], index: 1, kind: input, shape index: {}]   ;;  %s419_s2 = inlined_call_operand.vmem [shape: f32[128,25], index: 2, kind: output, shape index: {}]  }
   0x1   :  { %v39_v0 = vld [vmem:[%s417_s0 + $0x60] sm:$0xf]  ;;  %v38_v1 = vld [vmem:[%s417_s0 + $0x58] sm:$0xff]  ;;  %v37_v2 = vld [vmem:[%s417_s0 + $0x50] sm:$0xff] }
   0x2   :  { %197 = vmatpush.msk.msra.mxu2 %vm89_vm0, %v39_v0  ;;  %198 = vmatpush.msk.msra.mxu3 %vm89_vm0, %v39_v0  ;;  %v36_v3 = vld [vmem:[%s417_s0 + $0x48] sm:$0xff]  ;;  %v35_v4 = vld [vmem:[%s417_s0 + $0x40] sm:$0xff]  ;;  %v34_v5 = vld [vmem:[%s417_s0 + $0x38] sm:$0xff] }
   0x3   :  { %179 = vmatpush.msk.msra.mxu0 %vm89_vm0, %v39_v0  ;;  %196 = vmatpush.msk.msra.mxu1 %vm89_vm0, %v39_v0  ;;  %v33_v6 = vld [vmem:[%s417_s0 + $0x30] sm:$0xff]  ;;  %v32_v7 = vld [vmem:[%s417_s0 + $0x28] sm:$0xff]  ;;  %v31_v8 = vld [vmem:[%s417_s0 + $0x20] sm:$0xff] }
   0x4   :  { %200 = vmatpush.msra.mxu2 %v38_v1  ;;  %201 = vmatpush.msra.mxu3 %v38_v1  ;;  %v30_v9 = vld [vmem:[%s417_s0 + $0x18] sm:$0xff]  ;;  %v29_v10 = vld [vmem:[%s417_s0 + $0x10] sm:$0xff]  ;;  %v28_v11 = vld [vmem:[%s417_s0 + $0x8] sm:$0xff] }
   0x5   :  { %97 = vmatpush.msra.mxu0 %v38_v1  ;;  %199 = vmatpush.msra.mxu1 %v38_v1  ;;  %v27_v12 = vld [vmem:[%s417_s0] sm:$0xff]  ;;  %v20_v17 = vld [vmem:[%s418_s1 + $0x48] sm:$0xff]  ;;  %v21_v21 = vld [vmem:[%s418_s1 + $0x50] sm:$0xff] }
   0x6   :  { %203 = vmatpush.msra.mxu2 %v37_v2  ;;  %204 = vmatpush.msra.mxu3 %v37_v2  ;;  %v19_v13 = vld [vmem:[%s418_s1 + $0x40] sm:$0xff]  ;;  %v24_v18 = vld [vmem:[%s418_s1 + $0x68] sm:$0xff]  ;;  %v25_v22 = vld [vmem:[%s418_s1 + $0x70] sm:$0xff] }
   0x7   :  { %98 = vmatpush.msra.mxu0 %v37_v2  ;;  %202 = vmatpush.msra.mxu1 %v37_v2  ;;  %v23_v14 = vld [vmem:[%s418_s1 + $0x60] sm:$0xff]  ;;  %v12_v19 = vld [vmem:[%s418_s1 + $0x8] sm:$0xff]  ;;  %v13_v23 = vld [vmem:[%s418_s1 + $0x10] sm:$0xff] }
   0x8   :  { %206 = vmatpush.msra.mxu2 %v36_v3  ;;  %207 = vmatpush.msra.mxu3 %v36_v3  ;;  %v11_v15 = vld [vmem:[%s418_s1] sm:$0xff]  ;;  %v16_v20 = vld [vmem:[%s418_s1 + $0x28] sm:$0xff]  ;;  %v17_v24 = vld [vmem:[%s418_s1 + $0x30] sm:$0xff] }
   0x9   :  { %99 = vmatpush.msra.mxu0 %v36_v3  ;;  %205 = vmatpush.msra.mxu1 %v36_v3  ;;  %v15_v16 = vld [vmem:[%s418_s1 + $0x20] sm:$0xff]  ;;  %v22_v25 = vld [vmem:[%s418_s1 + $0x58] sm:$0xff] }
   0xa   :  { %209 = vmatpush.msra.mxu2 %v35_v4  ;;  %210 = vmatpush.msra.mxu3 %v35_v4  ;;  %v26_v26 = vld [vmem:[%s418_s1 + $0x78] sm:$0xff] }
   0xb   :  { %100 = vmatpush.msra.mxu0 %v35_v4  ;;  %208 = vmatpush.msra.mxu1 %v35_v4  ;;  %v14_v27 = vld [vmem:[%s418_s1 + $0x18] sm:$0xff] }
   0xc   :  { %212 = vmatpush.msra.mxu2 %v34_v5  ;;  %213 = vmatpush.msra.mxu3 %v34_v5  ;;  %v18_v28 = vld [vmem:[%s418_s1 + $0x38] sm:$0xff] }
   0xd   :  { %101 = vmatpush.msra.mxu0 %v34_v5  ;;  %211 = vmatpush.msra.mxu1 %v34_v5 }
   0xe   :  { %215 = vmatpush.msra.mxu2 %v33_v6  ;;  %216 = vmatpush.msra.mxu3 %v33_v6 }
   0xf   :  { %102 = vmatpush.msra.mxu0 %v33_v6  ;;  %214 = vmatpush.msra.mxu1 %v33_v6 }
  0x10   :  { %218 = vmatpush.msra.mxu2 %v32_v7  ;;  %219 = vmatpush.msra.mxu3 %v32_v7 }
  0x11   :  { %103 = vmatpush.msra.mxu0 %v32_v7  ;;  %217 = vmatpush.msra.mxu1 %v32_v7 }
  0x12   :  { %221 = vmatpush.msra.mxu2 %v31_v8  ;;  %222 = vmatpush.msra.mxu3 %v31_v8 }
  0x13   :  { %104 = vmatpush.msra.mxu0 %v31_v8  ;;  %220 = vmatpush.msra.mxu1 %v31_v8 }
  0x14   :  { %224 = vmatpush.msra.mxu2 %v30_v9  ;;  %225 = vmatpush.msra.mxu3 %v30_v9 }
  0x15   :  { %105 = vmatpush.msra.mxu0 %v30_v9  ;;  %223 = vmatpush.msra.mxu1 %v30_v9 }
  0x16   :  { %227 = vmatpush.msra.mxu2 %v29_v10  ;;  %228 = vmatpush.msra.mxu3 %v29_v10 }
  0x17   :  { %106 = vmatpush.msra.mxu0 %v29_v10  ;;  %226 = vmatpush.msra.mxu1 %v29_v10 }
  0x18   :  { %230 = vmatpush.msra.mxu2 %v28_v11  ;;  %231 = vmatpush.msra.mxu3 %v28_v11 }
  0x19   :  { %107 = vmatpush.msra.mxu0 %v28_v11  ;;  %229 = vmatpush.msra.mxu1 %v28_v11 }
  0x1a   :  { %233 = vmatpush.msra.mxu2 %v27_v12  ;;  %234 = vmatpush.msra.mxu3 %v27_v12 }
  0x1b   :  { %188 = vmatmul.msk.f32.vlgmr.msra.gmra.mxu2 %vm40_vm1, %v19_v13  ;;  %192 = vmatmul.msk.f32.vlgmr.msra.gmra.mxu3 %vm40_vm1, %v23_v14 }
  0x1c   :  { %108 = vmatpush.msra.mxu0 %v27_v12  ;;  %232 = vmatpush.msra.mxu1 %v27_v12 }
  0x1d   :  { %180 = vmatmul.msk.f32.vlgmr.msra.gmra.mxu0 %vm40_vm1, %v11_v15  ;;  %184 = vmatmul.msk.f32.vlgmr.msra.gmra.mxu1 %vm40_vm1, %v15_v16 }
  0x23   :  { %189 = vmatmul.msk.f32.gmra.mxu2 %vm40_vm1, %v20_v17  ;;  %193 = vmatmul.msk.f32.gmra.mxu3 %vm40_vm1, %v24_v18 }
  0x25   :  { %181 = vmatmul.msk.f32.gmra.mxu0 %vm40_vm1, %v12_v19  ;;  %185 = vmatmul.msk.f32.gmra.mxu1 %vm40_vm1, %v16_v20 }
  0x2b   :  { %190 = vmatmul.msk.f32.gmra.mxu2 %vm40_vm1, %v21_v21  ;;  %194 = vmatmul.msk.f32.gmra.mxu3 %vm40_vm1, %v25_v22 }
  0x2d   :  { %182 = vmatmul.msk.f32.gmra.mxu0 %vm40_vm1, %v13_v23  ;;  %186 = vmatmul.msk.f32.gmra.mxu1 %vm40_vm1, %v17_v24 }
  0x33   :  { %191 = vmatmul.msk.f32.gmra.mxu2 %vm40_vm1, %v22_v25  ;;  %195 = vmatmul.msk.f32.gmra.mxu3 %vm40_vm1, %v26_v26 }
  0x35   :  { %183 = vmatmul.msk.f32.gmra.mxu0 %vm40_vm1, %v14_v27  ;;  %187 = vmatmul.msk.f32.gmra.mxu1 %vm40_vm1, %v18_v28 }
  0x9a   :  { %v110_v29 = vpop.f32.mrf.mxu0  ;;  %v122_v30 = vpop.f32.mrf.mxu1 }
  0x9b   :  { %159 = vst.msk [vmem:[%s419_s2] sm:$0xff] %vm158_vm2, %v110_v29 }
  0x9c   :  { %163 = vst.msk [vmem:[%s419_s2 + $0x20] sm:$0xff] %vm158_vm2, %v122_v30 }
  0x9e   :  { %v134_v31 = vpop.f32.mrf.mxu2  ;;  %v146_v32 = vpop.f32.mrf.mxu3 }
  0x9f   :  { %167 = vst.msk [vmem:[%s419_s2 + $0x40] sm:$0xff] %vm158_vm2, %v134_v31 }
  0xa0   :  { %171 = vst.msk [vmem:[%s419_s2 + $0x60] sm:$0xff] %vm158_vm2, %v146_v32 }
  0xa2   :  { %v113_v33 = vpop.f32.mrf.mxu0  ;;  %v125_v34 = vpop.f32.mrf.mxu1 }
  0xa3   :  { %160 = vst.msk [vmem:[%s419_s2 + $0x8] sm:$0xff] %vm158_vm2, %v113_v33 }
  0xa4   :  { %164 = vst.msk [vmem:[%s419_s2 + $0x28] sm:$0xff] %vm158_vm2, %v125_v34 }
  0xa6   :  { %v137_v35 = vpop.f32.mrf.mxu2  ;;  %v149_v36 = vpop.f32.mrf.mxu3 }
  0xa7   :  { %168 = vst.msk [vmem:[%s419_s2 + $0x48] sm:$0xff] %vm158_vm2, %v137_v35 }
  0xa8   :  { %172 = vst.msk [vmem:[%s419_s2 + $0x68] sm:$0xff] %vm158_vm2, %v149_v36 }
  0xaa   :  { %v116_v37 = vpop.f32.mrf.mxu0  ;;  %v128_v38 = vpop.f32.mrf.mxu1 }
  0xab   :  { %161 = vst.msk [vmem:[%s419_s2 + $0x10] sm:$0xff] %vm158_vm2, %v116_v37 }
  0xac   :  { %165 = vst.msk [vmem:[%s419_s2 + $0x30] sm:$0xff] %vm158_vm2, %v128_v38 }
  0xae   :  { %v140_v39 = vpop.f32.mrf.mxu2  ;;  %v152_v40 = vpop.f32.mrf.mxu3 }
  0xaf   :  { %169 = vst.msk [vmem:[%s419_s2 + $0x50] sm:$0xff] %vm158_vm2, %v140_v39 }
  0xb0   :  { %173 = vst.msk [vmem:[%s419_s2 + $0x70] sm:$0xff] %vm158_vm2, %v152_v40 }
  0xb2   :  { %v119_v41 = vpop.f32.mrf.mxu0  ;;  %v131_v42 = vpop.f32.mrf.mxu1 }
  0xb3   :  { %162 = vst.msk [vmem:[%s419_s2 + $0x18] sm:$0xff] %vm158_vm2, %v119_v41 }
  0xb4   :  { %166 = vst.msk [vmem:[%s419_s2 + $0x38] sm:$0xff] %vm158_vm2, %v131_v42 }
  0xb6   :  { %v143_v43 = vpop.f32.mrf.mxu2  ;;  %v155_v44 = vpop.f32.mrf.mxu3 }
  0xb7   :  { %170 = vst.msk [vmem:[%s419_s2 + $0x58] sm:$0xff] %vm158_vm2, %v143_v43 }
  0xb8   :  { %174 = vst.msk [vmem:[%s419_s2 + $0x78] sm:$0xff] %vm158_vm2, %v155_v44 }

</bundles_post_ra>
